<compile_context>
chip_gen: v5e
topology: v5e:2x2
jax: 0.10.0
libtpu: 0.0.40
codegen_flags: <defaults>
</compile_context>

<pallas_src>
import jax
import jax.numpy as jnp
import numpy as np
from jax.experimental import pallas as pl
from jax.experimental.pallas import tpu as pltpu


def _round_up(x, m):
    return (x + m - 1) // m * m


def _cdiv(a, b):
    return (a + b - 1) // b


def _num_tensorcores():
    # Best-effort query; only used to decide how many m tiles to shard across
    # (v7x has 2 TensorCores per chip, v5e/v6e have 1).
    try:
        return max(1, int(getattr(jax.devices()[0], "num_cores", 1)))
    except Exception:  # pragma: no cover
        return 1


def _segment_mean_kernel(seg_ref, feat_ref, out_ref, acc_ref):
    """One (m-tile, n-tile) step of the one-hot scatter-mean.

    seg_ref : (num_n_tiles, tile_n) int32  all segment ids, resident (DMA'd once)
    feat_ref: (C+1, tile_n)                transposed features with a fused ones row
    out_ref : (C, tile_m)                  per-segment mean, written on the last n step
    acc_ref : (C+1, tile_m) f32            running [sums ; counts] accumulator
    """
    n_step = pl.program_id(1)

    @pl.when(n_step == 0)
    def _():
        acc_ref[...] = jnp.zeros_like(acc_ref)

    c = out_ref.shape[0]
    tile_m = acc_ref.shape[1]
    tile_n = seg_ref.shape[1]
    m_base = pl.program_id(0) * tile_m

    # Shift the tiny seg vector (2 vreg ops) instead of adding m_base to the big iota.
    seg = seg_ref[n_step] - m_base                                   # (tile_n,) int32
    iota_m = jax.lax.broadcasted_iota(jnp.int32, (tile_m, tile_n), 0)  # constant
    # one_hot[m, p] = (seg[p] == m_base + m); 0/1 exact in bf16.
    one_hot = (iota_m == seg).astype(feat_ref.dtype)                 # (tile_m, tile_n)

    # (C+1, tile_n) x (tile_m, tile_n) contracting the lane dims of both
    # -> lane-dense (C+1, tile_m) f32 accumulator (the 'qd,kd->qk' MXU form).
    acc_ref[...] += jax.lax.dot_general(
        feat_ref[...], one_hot, (((1,), (1,)), ((), ())),
        preferred_element_type=jnp.float32)

    @pl.when(n_step == pl.num_programs(1) - 1)
    def _():
        acc = acc_ref[...]
        sums = acc[:c, :]                                            # (C, tile_m)
        cnt = acc[c:c + 1, :]                                        # fused counts
        inv = pl.reciprocal(jnp.maximum(cnt, 1.0), approx=True)      # EUP, ~free
        out_ref[...] = (sums * inv).astype(out_ref.dtype)


def scn_input_layer_mode4(coords, features, spatial, *,
                          tile_n=1024, max_tile_m=2048, num_m_tiles=None,
                          precise=False):
    """Forward of SparseConvNetUNet: scn.InputLayer(dim=3, spatial, mode=4).

    coords   int32  [N, 4] = (x, y, z, batch); features float32 [N, C].
    Returns (out [N, C], num_unique): row m = mean of all features whose coordinate
    is the m-th distinct coordinate in first-occurrence order; rows >= num_unique
    are zeros (static shapes).

    precise=True keeps the features in f32 on the MXU and uses an exact division
    (slower); the default bf16 + approx-reciprocal path has ~1e-3 relative error.
    """
    n, c = features.shape
    s = jnp.int32(spatial)

    # ---- glue (plain JAX, O(N log N)): first-occurrence-ordered dense segment ids ----
    key = (((coords[:, 3].astype(jnp.int32) * s + coords[:, 0]) * s
            + coords[:, 1]) * s + coords[:, 2])
    order = jnp.argsort(key, stable=True)
    sorted_key = key[order]
    is_first_sorted = jnp.concatenate(
        [jnp.ones((1,), jnp.bool_), sorted_key[1:] != sorted_key[:-1]])
    pos = jnp.arange(n, dtype=jnp.int32)
    # start position (in sorted order) of each element's equal-key group
    start_pos = jax.lax.cummax(jnp.where(is_first_sorted, pos, 0), axis=0)
    # stable sort => group head carries the smallest original index of that key
    first_idx_sorted = order[start_pos].astype(jnp.int32)
    first_idx = jnp.zeros((n,), jnp.int32).at[order].set(first_idx_sorted)
    is_first = first_idx == pos
    rank = jnp.cumsum(is_first.astype(jnp.int32)) - 1
    seg_ids = rank[first_idx]                                        # (N,) dense ids
    num_unique = is_first.sum()

    # ---- static padding / tiling ----
    # contraction (point) axis
    tile_n = max(128, min(_round_up(tile_n, 128), _round_up(n, 128)))
    n_pad = _round_up(n, tile_n)
    num_n_tiles = n_pad // tile_n

    # segment axis (lane dim of the swapped accumulator / output)
    m_min = _round_up(n, 128)
    if num_m_tiles is None:
        # one m tile per TensorCore (v7x: 2), but keep tiles >= 256 lanes;
        # v5e/v6e: single TC -> single m tile (no re-streaming of features).
        num_m_tiles = max(1, min(_num_tensorcores(), m_min // 256))
    tile_m = _round_up(_cdiv(m_min, num_m_tiles), 128)
    tile_m = min(tile_m, max_tile_m)   # keep the (tile_m, tile_n) one-hot a few MiB
    m_pad = _round_up(m_min, tile_m)

    feat_dtype = features.dtype if precise else jnp.bfloat16

    # padded points get seg id -1 (never matches) and all-zero feature/ones columns,
    # so they contribute nothing to either sums or counts.
    seg_pad = jnp.full((n_pad,), -1, jnp.int32).at[:n].set(seg_ids)
    seg_2d = seg_pad.reshape(num_n_tiles, tile_n)

    # transposed features with a fused ones ROW (counts), cast once in the wrapper.
    feats_t = jnp.concatenate(
        [features.astype(feat_dtype).T,
         jnp.ones((1, n), feat_dtype)], axis=0)                      # (C+1, N)
    feats_t = jnp.pad(feats_t, ((0, 0), (0, n_pad - n)))             # (C+1, n_pad)

    itemsize = 2 if feat_dtype == jnp.bfloat16 else 4
    cost = pl.CostEstimate(
        flops=2 * (c + 1) * n_pad * m_pad,
        transcendentals=m_pad,
        bytes_accessed=((m_pad // tile_m) * (c + 1) * n_pad * itemsize
                        + n_pad * 4 + c * m_pad * 4))

    out_t = pl.pallas_call(
        _segment_mean_kernel,
        out_shape=jax.ShapeDtypeStruct((c, m_pad), features.dtype),
        grid_spec=pltpu.PrefetchScalarGridSpec(
            num_scalar_prefetch=0,
            grid=(m_pad // tile_m, num_n_tiles),   # (segments, points=reduction)
            in_specs=[
                # whole seg table resident in VMEM (constant index map -> one DMA)
                pl.BlockSpec((num_n_tiles, tile_n), lambda m, p: (0, 0)),
                # transposed features + ones row, streamed along the point axis
                pl.BlockSpec((c + 1, tile_n), lambda m, p: (0, p)),
            ],
            out_specs=pl.BlockSpec((c, tile_m), lambda m, p: (0, m)),
            scratch_shapes=[pltpu.VMEM((c + 1, tile_m), jnp.float32)],
        ),
        compiler_params=pltpu.CompilerParams(
            dimension_semantics=("parallel", "arbitrary"),
            # tiles are capped so usage stays ~a few MiB; 32 MiB leaves headroom
            # even on v7x's 64 MiB physical VMEM.
            vmem_limit_bytes=32 * 1024 * 1024),
        cost_estimate=cost,
    )(seg_2d, feats_t)

    # pure layout plumbing back to the module's (N, C) output
    out = out_t[:, :n].T
    return out, num_unique


if __name__ == "__main__":
    N, C, SPATIAL, BATCH = 128, 32, 16, 2

    rng = jax.random.PRNGKey(0)
    k1, k2, k3 = jax.random.split(rng, 3)
    # restrict coords to a small sub-volume so duplicate coordinates actually occur
    xyz = jax.random.randint(k1, (N, 3), 0, 4, dtype=jnp.int32)
    bidx = jax.random.randint(k2, (N, 1), 0, BATCH, dtype=jnp.int32)
    coords = jnp.concatenate([xyz, bidx], axis=1)        # (N, 4) = (x, y, z, batch)
    feats = jax.random.normal(k3, (N, C), dtype=jnp.float32)

    out, num_unique = scn_input_layer_mode4(coords, feats, SPATIAL)
    out = jax.block_until_ready(out)
    num_unique = int(num_unique)

    # ---- reference check (plain numpy segment mean, first-occurrence order) ----
    coords_np = np.asarray(coords)
    feats_np = np.asarray(feats)
    key_np = (((coords_np[:, 3] * SPATIAL + coords_np[:, 0]) * SPATIAL
               + coords_np[:, 1]) * SPATIAL + coords_np[:, 2])
    seen = {}
    ref = np.zeros((N, C), np.float32)
    cnt = np.zeros((N,), np.float32)
    for i, k in enumerate(key_np):
        if k not in seen:
            seen[k] = len(seen)
        ref[seen[k]] += feats_np[i]
        cnt[seen[k]] += 1.0
    nu = len(seen)
    ref[:nu] /= cnt[:nu, None]

    assert num_unique == nu, (num_unique, nu)
    # bf16 feature operands on the MXU (rel err ~2^-9) + approx reciprocal -> ~1e-2 bound
    assert np.allclose(np.asarray(out), ref, atol=2e-2), "kernel/reference mismatch"
    print("KERNEL_OK")
</pallas_src>

<mosaic_0001>
module attributes {stable_mosaic.version = 11 : i64} {
  func.func @_segment_mean_kernel(%arg0: i32, %arg1: i32, %arg2: memref<1x128xi32, #tpu.memory_space<vmem>>, %arg3: memref<33x128xbf16, #tpu.memory_space<vmem>>, %arg4: memref<32x128xf32, #tpu.memory_space<vmem>>, %arg5: memref<33x128xf32, #tpu.memory_space<vmem>>) attributes {dimension_semantics = [#tpu.dimension_semantics<parallel>, #tpu.dimension_semantics<arbitrary>], iteration_bounds = array<i64: 1, 1>, scalar_prefetch = 0 : i64, scratch_operands = 1 : i64, tpu.core_type = #tpu.core_type<tc>, window_params = [{pipeline_mode = #tpu.pipeline_mode<synchronous>, transform_indices = @transform_0, window_bounds = array<i64: 1, 128>}, {transform_indices = @transform_1, window_bounds = array<i64: 33, 128>}, {transform_indices = @transform_2, window_bounds = array<i64: 32, 128>}]} {
    %c0_i32 = arith.constant 0 : i32
    %0 = arith.cmpi eq, %arg1, %c0_i32 : i32
    %1 = arith.extui %0 : i1 to i32
    %c0_i32_0 = arith.constant 0 : i32
    %2 = arith.cmpi ne, %1, %c0_i32_0 : i32
    scf.if %2 {
      %cst_9 = arith.constant 0.000000e+00 : f32
      %24 = vector.broadcast %cst_9 : f32 to vector<33x128xf32>
      %c0_10 = arith.constant 0 : index
      %c0_11 = arith.constant 0 : index
      %25 = vector.load %arg5[%c0_10, %c0_11] : memref<33x128xf32, #tpu.memory_space<vmem>>, vector<33x128xf32>
      tpu.vector_store %arg5[%c0_10, %c0_11], %24 {strides = array<i32>} : memref<33x128xf32, #tpu.memory_space<vmem>>, vector<33x128xf32>,
    } else {
    }
    %c128_i32 = arith.constant 128 : i32
    %3 = arith.muli %arg0, %c128_i32 : i32
    %4 = arith.index_cast %arg1 : i32 to index
    %c0 = arith.constant 0 : index
    %5 = vector.load %arg2[%4, %c0] : memref<1x128xi32, #tpu.memory_space<vmem>>, vector<1x128xi32>
    %6 = vector.shape_cast %5 : vector<1x128xi32> to vector<128xi32>
    %7 = vector.broadcast %3 : i32 to vector<128xi32>
    %8 = arith.subi %6, %7 : vector<128xi32>
    %9 = tpu.iota {dimensions = array<i32: 0>} : vector<128x128xi32>
    %10 = vector.shape_cast %8 : vector<128xi32> to vector<1x128xi32>
    %11 = vector.broadcast %10 : vector<1x128xi32> to vector<128x128xi32>
    %12 = arith.cmpi eq, %9, %11 : vector<128x128xi32>
    %13 = arith.extui %12 : vector<128x128xi1> to vector<128x128xi32>
    %14 = arith.sitofp %13 : vector<128x128xi32> to vector<128x128xf32>
    %15 = arith.truncf %14 : vector<128x128xf32> to vector<128x128xbf16>
    %c0_1 = arith.constant 0 : index
    %c0_2 = arith.constant 0 : index
    %16 = vector.load %arg5[%c0_1, %c0_2] : memref<33x128xf32, #tpu.memory_space<vmem>>, vector<33x128xf32>
    %c0_3 = arith.constant 0 : index
    %c0_4 = arith.constant 0 : index
    %17 = vector.load %arg3[%c0_3, %c0_4] : memref<33x128xbf16, #tpu.memory_space<vmem>>, vector<33x128xbf16>
    %cst = arith.constant dense<0.000000e+00> : vector<33x128xf32>
    %18 = tpu.matmul %17, %15, %cst {dimension_numbers = #tpu.dot_dimension_numbers<[1], [1], [0], [0], [0, 0, 1, 0], [], []>} : vector<33x128xbf16>, vector<128x128xbf16>, vector<33x128xf32> -> vector<33x128xf32>
    %19 = arith.addf %16, %18 : vector<33x128xf32>
    %c0_5 = arith.constant 0 : index
    %c0_6 = arith.constant 0 : index
    %20 = vector.load %arg5[%c0_5, %c0_6] : memref<33x128xf32, #tpu.memory_space<vmem>>, vector<33x128xf32>
    tpu.vector_store %arg5[%c0_5, %c0_6], %19 {strides = array<i32>} : memref<33x128xf32, #tpu.memory_space<vmem>>, vector<33x128xf32>,
    %c0_i32_7 = arith.constant 0 : i32
    %21 = arith.cmpi eq, %arg1, %c0_i32_7 : i32
    %22 = arith.extui %21 : i1 to i32
    %c0_i32_8 = arith.constant 0 : i32
    %23 = arith.cmpi ne, %22, %c0_i32_8 : i32
    scf.if %23 {
      %c0_9 = arith.constant 0 : index
      %c0_10 = arith.constant 0 : index
      %24 = vector.load %arg5[%c0_9, %c0_10] : memref<33x128xf32, #tpu.memory_space<vmem>>, vector<33x128xf32>
      %25 = vector.extract_strided_slice %24 {offsets = [0, 0], sizes = [32, 128], strides = [1, 1]} : vector<33x128xf32> to vector<32x128xf32>
      %26 = vector.extract_strided_slice %24 {offsets = [32, 0], sizes = [1, 128], strides = [1, 1]} : vector<33x128xf32> to vector<1x128xf32>
      %cst_11 = arith.constant 1.000000e+00 : f32
      %27 = vector.broadcast %cst_11 : f32 to vector<1x128xf32>
      %28 = arith.maximumf %26, %27 : vector<1x128xf32>
      %29 = tpu.reciprocal %28 {approx = true} : vector<1x128xf32> -> vector<1x128xf32>
      %30 = vector.broadcast %29 : vector<1x128xf32> to vector<32x128xf32>
      %31 = arith.mulf %25, %30 : vector<32x128xf32>
      %c0_12 = arith.constant 0 : index
      %c0_13 = arith.constant 0 : index
      %32 = vector.load %arg4[%c0_12, %c0_13] : memref<32x128xf32, #tpu.memory_space<vmem>>, vector<32x128xf32>
      tpu.vector_store %arg4[%c0_12, %c0_13], %31 {strides = array<i32>} : memref<32x128xf32, #tpu.memory_space<vmem>>, vector<32x128xf32>,
    } else {
    }
    return
  }
  func.func @transform_0(%arg0: i32, %arg1: i32) -> (i32, i32) {
    %c0_i32 = arith.constant 0 : i32
    %c0_i32_0 = arith.constant 0 : i32
    %c0_i32_1 = arith.constant 0 : i32
    return %c0_i32, %c0_i32_0 : i32, i32
  }
  func.func @transform_1(%arg0: i32, %arg1: i32) -> (i32, i32) {
    %c0_i32 = arith.constant 0 : i32
    %c0_i32_0 = arith.constant 0 : i32
    return %c0_i32, %arg1 : i32, i32
  }
  func.func @transform_2(%arg0: i32, %arg1: i32) -> (i32, i32) {
    %c0_i32 = arith.constant 0 : i32
    %c0_i32_0 = arith.constant 0 : i32
    return %c0_i32, %arg0 : i32, i32
  }
}

</mosaic_0001>

<bundles_post_ra>
// kernel: tpu_custom_call.1
= control target key start
LH: loop header
LB: loop body
LE: loop exit
PB: predicated region body
PF: predicated region fallthrough
CT: control target
= control target key end

     0   :  { %7 = vsyncpa [#allocation4], 0  ;;  %s426_s0 = inlined_call_operand.hbm [shape: s32[1,128], index: 0, kind: input, shape index: {}]   ;;  %s427_s1 = inlined_call_operand.hbm [shape: bf16[33,128], index: 1, kind: input, shape index: {}]   ;;  %s428_s2 = inlined_call_operand.hbm [shape: f32[32,128], index: 2, kind: output, shape index: {}]  }
   0x1   :  { %8 = vsyncpa [#allocation7], 0 }
   0x2   :  { %9 = vsyncpa [#allocation5], 0  ;;  %s15_s11 = sshll.u32 %s426_s0, 4  ;;  %s375_s12 = smov [#allocation3]   ;;  %s16_s11 = int_to_ptr.hbm [resolvable:$true] %s15_s11 }
   0x3   :  { %s17_s13 = sshll.u32 %s375_s12, 4  ;;  %s25_s16 = sshll.u32 %s427_s1, 4  ;;  %s18_s13 = int_to_ptr.vmem [resolvable:$true] %s17_s13  ;;  %s26_s16 = int_to_ptr.hbm [resolvable:$true] %s25_s16 }
   0x4   :  { %20 = dma.hbm_to_vmem [thread:$0]  %s16_s11, 16, %s18_s13, [#allocation4]  }
   0x5   :  { %s376_s17 = smov [#allocation6]   ;;  %s377_s19 = smov 64  }
   0x6   :  { %s27_s18 = sshll.u32 %s376_s17, 4  ;;  %s378_s20 = smov 4   ;;  %s28_s18 = int_to_ptr.vmem [resolvable:$true] %s27_s18 }
   0x7   :  { %33 = dma.hbm_to_vmem [thread:$0]  %s26_s16, 320, %s28_s18, [#allocation7], %s377_s19, %s377_s19, %s378_s20  }
   0x8   :  { %369 = dma.done.wait [#allocation4], 16  }
   0x9   :  { %370 = vsyncadd [#allocation4], 4294967280 }
   0xa   :  { %371 = dma.done.wait [#allocation7], 320  }
   0xb   :  { %372 = vsyncadd [#allocation7], 4294966976  ;;  %v55_v0 = vlaneseq  ;;  %v294_v4 = vld [vmem:[#allocation3] ss:$0 sm:$0xff]  ;;  %v379_v7 = vmov 1.0|1.0  }
   0xc   :  { %v380_v16 = vmov 0.0   ;;  %v138_v20 = vld [vmem:[#allocation6 + $0x10] sm:$0x1]  ;;  %v267_v23 = vld [vmem:[#allocation6] sm:$0xff]  ;;  %v268_v24 = vld [vmem:[#allocation6 + $0x8] sm:$0xff]  ;;  %s381_s0 = smov [#allocation8]  }
   0xd   :  { %v405_v1 = vshrl.u32 %v55_v0, 7  ;;  %50 = vst [vmem:[#allocation2 + $0x18] sm:$0x1] %v380_v16  ;;  %v148_v21 = vunpack.c.l.b16 %v138_v20  ;;  %s211_s1 = sshll.u32 %s381_s0, 4  ;;  %s213_s23 = sshll.u32 %s428_s2, 4  ;;  %s212_s1 = int_to_ptr.vmem [resolvable:$true] %s211_s1  ;;  %s214_s23 = int_to_ptr.hbm [resolvable:$true] %s213_s23 }
   0xe   :  { %s382_s24 = smov 128   ;;  %s383_s25 = smov 8  }
   0xf   :  { %v70_v2 = vadd.s32 112, %v405_v1  ;;  %v71_v3 = vadd.s32 120, %v405_v1  ;;  %v68_v5 = vadd.s32 96, %v405_v1  ;;  %v69_v6 = vadd.s32 104, %v405_v1 }
  0x10   :  { %v66_v8 = vadd.s32 80, %v405_v1  ;;  %v67_v9 = vadd.s32 88, %v405_v1  ;;  %v64_v10 = vadd.s32 64, %v405_v1  ;;  %v65_v11 = vadd.s32 72, %v405_v1 }
  0x11   :  { %vm87_vm0 = vcmp.eq.s32.totalorder %v70_v2, %v294_v4  ;;  %vm88_vm1 = vcmp.eq.s32.totalorder %v71_v3, %v294_v4  ;;  %vm85_vm3 = vcmp.eq.s32.totalorder %v68_v5, %v294_v4  ;;  %vm86_vm4 = vcmp.eq.s32.totalorder %v69_v6, %v294_v4 }
  0x12   :  { %vm251_vm2 = vmpackc.low %vm88_vm1, %vm87_vm0  ;;  %vm83_vm6 = vcmp.eq.s32.totalorder %v66_v8, %v294_v4  ;;  %vm84_vm7 = vcmp.eq.s32.totalorder %v67_v9, %v294_v4  ;;  %vm81_vm9 = vcmp.eq.s32.totalorder %v64_v10, %v294_v4  ;;  %vm82_vm10 = vcmp.eq.s32.totalorder %v65_v11, %v294_v4 }
  0x13   :  { %270 = vmatpush.bf16.xpose.msk.msra.mxu2 %vm251_vm2, %v379_v7  ;;  %252 = vmatpush.bf16.xpose.msk.msra.mxu0 %vm251_vm2, %v379_v7  ;;  %vm253_vm5 = vmpackc.low %vm86_vm4, %vm85_vm3  ;;  %v62_v12 = vadd.s32 48, %v405_v1  ;;  %v63_v13 = vadd.s32 56, %v405_v1  ;;  %v60_v14 = vadd.s32 32, %v405_v1  ;;  %v61_v15 = vadd.s32 40, %v405_v1 }
  0x14   :  { %269 = vmatpush.bf16.xpose.msk.msra.mxu1 %vm251_vm2, %v379_v7  ;;  %vm255_vm8 = vmpackc.low %vm84_vm7, %vm83_vm6  ;;  %v58_v17 = vadd.s32 16, %v405_v1  ;;  %v59_v18 = vadd.s32 24, %v405_v1  ;;  %v57_v19 = vadd.s32 8, %v405_v1  ;;  %v151_v22 = vpack.c.b16 %v148_v21, %v148_v21  ;;  %v133_v27 = vld [vmem:[#allocation2 + $0x18] sm:$0x1] }
  0x15   :  { %vm257_vm11 = vmpackc.low %vm82_vm10, %vm81_vm9  ;;  %vm79_vm12 = vcmp.eq.s32.totalorder %v62_v12, %v294_v4  ;;  %vm80_vm13 = vcmp.eq.s32.totalorder %v63_v13, %v294_v4  ;;  %vm77_vm15 = vcmp.eq.s32.totalorder %v60_v14, %v294_v4  ;;  %vm78_vm0 = vcmp.eq.s32.totalorder %v61_v15, %v294_v4 }
  0x16   :  { %vm259_vm14 = vmpackc.low %vm80_vm13, %vm79_vm12  ;;  %vm75_vm2 = vcmp.eq.s32.totalorder %v58_v17, %v294_v4  ;;  %vm76_vm3 = vcmp.eq.s32.totalorder %v59_v18, %v294_v4  ;;  %vm74_vm6 = vcmp.eq.s32.totalorder %v57_v19, %v294_v4 }
  0x17   :  { %vm261_vm1 = vmpackc.low %vm78_vm0, %vm77_vm15 }
  0x18   :  { %vm263_vm4 = vmpackc.low %vm76_vm3, %vm75_vm2 }
  0x1b   :  { %272 = vmatpush.bf16.xpose.msk.msra.mxu2 %vm253_vm5, %v379_v7  ;;  %254 = vmatpush.bf16.xpose.msk.msra.mxu0 %vm253_vm5, %v379_v7 }
  0x1c   :  { %271 = vmatpush.bf16.xpose.msk.msra.mxu1 %vm253_vm5, %v379_v7  ;;  %vm73_vm5 = vcmp.eq.s32.totalorder %v405_v1, %v294_v4 }
  0x1d   :  { %vm265_vm7 = vmpackc.low %vm74_vm6, %vm73_vm5 }
  0x23   :  { %274 = vmatpush.bf16.xpose.msk.msra.mxu2 %vm255_vm8, %v379_v7  ;;  %256 = vmatpush.bf16.xpose.msk.msra.mxu0 %vm255_vm8, %v379_v7 }
  0x24   :  { %273 = vmatpush.bf16.xpose.msk.msra.mxu1 %vm255_vm8, %v379_v7 }
  0x2b   :  { %276 = vmatpush.bf16.xpose.msk.msra.mxu2 %vm257_vm11, %v379_v7  ;;  %258 = vmatpush.bf16.xpose.msk.msra.mxu0 %vm257_vm11, %v379_v7 }
  0x2c   :  { %275 = vmatpush.bf16.xpose.msk.msra.mxu1 %vm257_vm11, %v379_v7 }
  0x33   :  { %278 = vmatpush.bf16.xpose.msk.msra.mxu2 %vm259_vm14, %v379_v7  ;;  %260 = vmatpush.bf16.xpose.msk.msra.mxu0 %vm259_vm14, %v379_v7 }
  0x34   :  { %277 = vmatpush.bf16.xpose.msk.msra.mxu1 %vm259_vm14, %v379_v7 }
  0x3b   :  { %280 = vmatpush.bf16.xpose.msk.msra.mxu2 %vm261_vm1, %v379_v7  ;;  %262 = vmatpush.bf16.xpose.msk.msra.mxu0 %vm261_vm1, %v379_v7 }
  0x3c   :  { %279 = vmatpush.bf16.xpose.msk.msra.mxu1 %vm261_vm1, %v379_v7 }
  0x43   :  { %282 = vmatpush.bf16.xpose.msk.msra.mxu2 %vm263_vm4, %v379_v7  ;;  %264 = vmatpush.bf16.xpose.msk.msra.mxu0 %vm263_vm4, %v379_v7 }
  0x44   :  { %281 = vmatpush.bf16.xpose.msk.msra.mxu1 %vm263_vm4, %v379_v7 }
  0x4b   :  { %284 = vmatpush.bf16.xpose.msk.msra.mxu2 %vm265_vm7, %v379_v7  ;;  %266 = vmatpush.bf16.xpose.msk.msra.mxu0 %vm265_vm7, %v379_v7 }
  0x4c   :  { %283 = vmatpush.bf16.xpose.msk.msra.mxu1 %vm265_vm7, %v379_v7 }
  0x52   :  { %173 = vmatmul.bf16.vlgmr.msra.gmra.mxu2 %v151_v22  ;;  %163 = vmatmul.bf16.vlgmr.msra.gmra.mxu0 %v267_v23 }
  0x53   :  { %168 = vmatmul.bf16.vlgmr.msra.gmra.mxu1 %v268_v24 }
  0xcf   :  { %v164_v25 = vpop.f32.mrf.mxu0 }
  0xd0   :  { %v169_v26 = vpop.f32.mrf.mxu1 }
  0xd5   :  { %v174_v28 = vpop.f32.mrf.mxu2 }
  0xd6   :  { %v182_v29 = vadd.f32 %v174_v28, %v133_v27 }
  0xd7   :  { %v166_v30 = vpop.f32.mrf.mxu0 }
  0xd8   :  { %187 = vst [vmem:[#allocation2 + $0x18] sm:$0x1] %v182_v29  ;;  %v171_v31 = vpop.f32.mrf.mxu1 }
  0xdd   :  { %v176_v32 = vpop.f32.mrf.mxu2 }
  0xdf   :  { %v195_v33 = vld [vmem:[#allocation2 + $0x18] sm:$0x1] }
  0xe0   :  { %v196_v34 = vmax.f32 %v195_v33, 1.0 }
  0xe2   :  { %295 = vrcp.f32 %v196_v34 }
  0xe8   :  { %v296_v35 = vpop.eup %295 }
  0xe9   :  { %v198_v36 = vperm.slane %v296_v35, 0 }
  0xeb   :  { %v199_v37 = vmul.f32 %v198_v36, %v164_v25  ;;  %v200_v38 = vmul.f32 %v198_v36, %v166_v30  ;;  %v201_v39 = vmul.f32 %v198_v36, %v169_v26  ;;  %v202_v40 = vmul.f32 %v198_v36, %v171_v31 }
  0xed   :  { %203 = vst [vmem:[#allocation8] sm:$0xff] %v199_v37 }
  0xee   :  { %204 = vst [vmem:[#allocation8 + $0x8] sm:$0xff] %v200_v38 }
  0xef   :  { %205 = vst [vmem:[#allocation8 + $0x10] sm:$0xff] %v201_v39 }
  0xf0   :  { %206 = vst [vmem:[#allocation8 + $0x18] sm:$0xff] %v202_v40 }
  0xf1   :  { %219 = dma.vmem_to_hbm [thread:$0]  %s212_s1, 512, %s214_s23, [#allocation5], %s382_s24, %s382_s24, %s383_s25  }
  0xf2   :  { %373 = dma.done.wait [#allocation5], 512  }
  0xf3   :  { %374 = vsyncadd [#allocation5], 4294966784 }
  0xf4   :  { %224 = vsyncpa [#allocation4], 1 }
  0xf5   :  { %225 = vsyncpa [#allocation7], 1 }
  0xf6   :  { %226 = vsyncpa [#allocation5], 1 }

</bundles_post_ra>
